<compile_context>
chip_gen: v6e
topology: v6e:2x2x1
jax: 0.10.0
libtpu: 0.0.40
codegen_flags: <defaults>
</compile_context>

<pallas_src>
import math
import functools

import jax
import jax.numpy as jnp
from jax.experimental import pallas as pl
from jax.experimental.pallas import tpu as pltpu


def _round_up(x, m):
    return ((x + m - 1) // m) * m


# --------------------- stage 1: support = X @ W (row-tiled) ---------------------

def _support_kernel(x_ref, w_ref, o_ref):
    o_ref[...] = jnp.dot(
        x_ref[...], w_ref[...], preferred_element_type=jnp.float32
    ).astype(o_ref.dtype)


# ------------- stage 2: out = adj @ support (+ bias), (rows, k) grid -------------

def _aggregate_kernel_bias(adj_ref, s_ref, b_ref, o_ref, acc_ref):
    k = pl.program_id(1)

    @pl.when(k == 0)
    def _():
        acc_ref[...] = jnp.zeros_like(acc_ref)

    acc_ref[...] += jnp.dot(
        adj_ref[...], s_ref[...], preferred_element_type=jnp.float32
    )

    @pl.when(k == pl.num_programs(1) - 1)
    def _():
        o_ref[...] = (acc_ref[...] + b_ref[...]).astype(o_ref.dtype)


def _aggregate_kernel_nobias(adj_ref, s_ref, o_ref, acc_ref):
    k = pl.program_id(1)

    @pl.when(k == 0)
    def _():
        acc_ref[...] = jnp.zeros_like(acc_ref)

    acc_ref[...] += jnp.dot(
        adj_ref[...], s_ref[...], preferred_element_type=jnp.float32
    )

    @pl.when(k == pl.num_programs(1) - 1)
    def _():
        o_ref[...] = acc_ref[...].astype(o_ref.dtype)


@functools.partial(jax.jit, static_argnames=("use_bias",))
def graph_convolution(x, adj, weight, bias=None, use_bias=True):
    """GCN forward: adj @ (x @ weight) + bias, as tiled Pallas TPU kernels.

    x:      (N, F_in)     float32
    adj:    (N, N)        float32 (dense; spmm semantics == dense matmul)
    weight: (F_in, F_out) float32
    bias:   (F_out,)      float32 (only used when use_bias=True)
    returns (N, F_out)    float32
    """
    n, f_in = x.shape
    f_out = weight.shape[1]

    # ---- pad to TPU-friendly shapes (lane-dense last dims, tileable rows) ----
    n_p = _round_up(n, 128)
    f_in_p = _round_up(f_in, 128)
    f_out_p = _round_up(f_out, 128)

    # Tile sizes for the adj @ support stage (adj streamed as (TM, TK) tiles).
    # Sized so double-buffered tiles + accumulator fit comfortably in scoped VMEM
    # on v5e (16 MiB default) / v6e (32 MiB) / v7x (32 MiB scoped, 64 MiB phys).
    tm = 256 if n_p % 256 == 0 else 128
    tk = 512 if n_p % 512 == 0 else (256 if n_p % 256 == 0 else 128)
    tm = min(tm, n_p)
    tk = min(tk, n_p)

    f32 = jnp.float32
    x_p = jnp.pad(x.astype(f32), ((0, n_p - n), (0, f_in_p - f_in)))
    adj_p = jnp.pad(adj.astype(f32), ((0, n_p - n), (0, n_p - n)))
    w_p = jnp.pad(weight.astype(f32), ((0, f_in_p - f_in), (0, f_out_p - f_out)))

    # ---------------- stage 1: support = X @ W ----------------
    support = pl.pallas_call(
        _support_kernel,
        out_shape=jax.ShapeDtypeStruct((n_p, f_out_p), f32),
        grid_spec=pltpu.PrefetchScalarGridSpec(
            num_scalar_prefetch=0,
            grid=(n_p // tm,),
            in_specs=[
                pl.BlockSpec((tm, f_in_p), lambda i: (i, 0)),      # x row tile
                pl.BlockSpec((f_in_p, f_out_p), lambda i: (0, 0)),  # weight resident
            ],
            out_specs=pl.BlockSpec((tm, f_out_p), lambda i: (i, 0)),
        ),
        compiler_params=pltpu.CompilerParams(
            dimension_semantics=("parallel",),
            vmem_limit_bytes=32 * 1024 * 1024,
        ),
    )(x_p, w_p)

    # ---------------- stage 2: out = adj @ support (+ bias) ----------------
    grid = (n_p // tm, n_p // tk)

    adj_spec = pl.BlockSpec((tm, tk), lambda i, k: (i, k))
    sup_spec = pl.BlockSpec((tk, f_out_p), lambda i, k: (k, 0))
    out_spec = pl.BlockSpec((tm, f_out_p), lambda i, k: (i, 0))

    # Explicit scoped-VMEM budget: double-buffered input tiles + resident output
    # + accumulator scratch, with headroom (clamped to a v7x-safe 32 MiB).
    tile_bytes = 4 * (2 * tm * tk            # adj tiles (double-buffered)
                      + 2 * tk * f_out_p     # support tiles
                      + 2 * tm * f_out_p     # output block
                      + tm * f_out_p         # accumulator scratch
                      + 2 * f_out_p)         # bias
    vmem_limit = int(min(max(2 * tile_bytes, 16 * 1024 * 1024), 32 * 1024 * 1024))

    compiler_params = pltpu.CompilerParams(
        dimension_semantics=("parallel", "arbitrary"),
        vmem_limit_bytes=vmem_limit,
    )

    if use_bias:
        b_p = jnp.pad(bias.astype(f32), (0, f_out_p - f_out)).reshape(1, f_out_p)
        out_p = pl.pallas_call(
            _aggregate_kernel_bias,
            out_shape=jax.ShapeDtypeStruct((n_p, f_out_p), f32),
            grid_spec=pltpu.PrefetchScalarGridSpec(
                num_scalar_prefetch=0,
                grid=grid,
                in_specs=[
                    adj_spec,
                    sup_spec,
                    pl.BlockSpec((1, f_out_p), lambda i, k: (0, 0)),
                ],
                out_specs=out_spec,
                scratch_shapes=[pltpu.VMEM((tm, f_out_p), jnp.float32)],
            ),
            compiler_params=compiler_params,
        )(adj_p, support, b_p)
    else:
        out_p = pl.pallas_call(
            _aggregate_kernel_nobias,
            out_shape=jax.ShapeDtypeStruct((n_p, f_out_p), f32),
            grid_spec=pltpu.PrefetchScalarGridSpec(
                num_scalar_prefetch=0,
                grid=grid,
                in_specs=[adj_spec, sup_spec],
                out_specs=out_spec,
                scratch_shapes=[pltpu.VMEM((tm, f_out_p), jnp.float32)],
            ),
            compiler_params=compiler_params,
        )(adj_p, support)

    return out_p[:n, :f_out]


if __name__ == "__main__":
    key = jax.random.PRNGKey(0)
    k_x, k_adj, k_w, k_b = jax.random.split(key, 4)

    # Small GCN problem: N nodes, in_features -> out_features.
    N = 64
    in_features = 32
    out_features = 16

    # Node features.
    x = jax.random.normal(k_x, (N, in_features), dtype=jnp.float32)

    # Symmetric-normalized-ish dense adjacency (stand-in for sparse adj).
    a = (jax.random.uniform(k_adj, (N, N)) < 0.1).astype(jnp.float32)
    a = a + a.T + jnp.eye(N, dtype=jnp.float32)
    a = jnp.clip(a, 0.0, 1.0)
    deg = jnp.sum(a, axis=1, keepdims=True)
    adj = a / deg  # row-normalized adjacency

    # Deterministic parameter init matching reset_parameters():
    #   uniform(-stdv, stdv), stdv = 1/sqrt(out_features)
    stdv = 1.0 / math.sqrt(out_features)
    weight = jax.random.uniform(
        k_w, (in_features, out_features), minval=-stdv, maxval=stdv,
        dtype=jnp.float32)
    bias = jax.random.uniform(
        k_b, (out_features,), minval=-stdv, maxval=stdv, dtype=jnp.float32)

    # With bias.
    out = graph_convolution(x, adj, weight, bias, use_bias=True)
    out = jax.block_until_ready(out)
    ref = adj @ (x @ weight) + bias
    assert out.shape == (N, out_features)
    assert jnp.allclose(out, ref, atol=1e-4, rtol=1e-4)

    # Without bias (exercises the no-bias kernel variant).
    out_nb = graph_convolution(x, adj, weight, None, use_bias=False)
    out_nb = jax.block_until_ready(out_nb)
    ref_nb = adj @ (x @ weight)
    assert jnp.allclose(out_nb, ref_nb, atol=1e-4, rtol=1e-4)

    print("KERNEL_OK")
</pallas_src>

<mosaic_0001>
module attributes {stable_mosaic.version = 11 : i64} {
  func.func @_support_kernel(%arg0: i32, %arg1: memref<128x128xf32, #tpu.memory_space<vmem>>, %arg2: memref<128x128xf32, #tpu.memory_space<vmem>>, %arg3: memref<128x128xf32, #tpu.memory_space<vmem>>) attributes {dimension_semantics = [#tpu.dimension_semantics<parallel>], iteration_bounds = array<i64: 1>, scalar_prefetch = 0 : i64, scratch_operands = 0 : i64, tpu.core_type = #tpu.core_type<tc>, window_params = [{transform_indices = @transform_0, window_bounds = array<i64: 128, 128>}, {pipeline_mode = #tpu.pipeline_mode<synchronous>, transform_indices = @transform_1, window_bounds = array<i64: 128, 128>}, {transform_indices = @transform_2, window_bounds = array<i64: 128, 128>}]} {
    %c0 = arith.constant 0 : index
    %c0_0 = arith.constant 0 : index
    %0 = vector.load %arg1[%c0, %c0_0] : memref<128x128xf32, #tpu.memory_space<vmem>>, vector<128x128xf32>
    %c0_1 = arith.constant 0 : index
    %c0_2 = arith.constant 0 : index
    %1 = vector.load %arg2[%c0_1, %c0_2] : memref<128x128xf32, #tpu.memory_space<vmem>>, vector<128x128xf32>
    %cst = arith.constant dense<0.000000e+00> : vector<128x128xf32>
    %2 = tpu.matmul %0, %1, %cst {dimension_numbers = #tpu.dot_dimension_numbers<[1], [0], [0], [1], [0, 0, 1, 1], [], []>} : vector<128x128xf32>, vector<128x128xf32>, vector<128x128xf32> -> vector<128x128xf32>
    %c0_3 = arith.constant 0 : index
    %c0_4 = arith.constant 0 : index
    %3 = vector.load %arg3[%c0_3, %c0_4] : memref<128x128xf32, #tpu.memory_space<vmem>>, vector<128x128xf32>
    tpu.vector_store %arg3[%c0_3, %c0_4], %2 {strides = array<i32>} : memref<128x128xf32, #tpu.memory_space<vmem>>, vector<128x128xf32>,
    return
  }
  func.func @transform_0(%arg0: i32) -> (i32, i32) {
    %c0_i32 = arith.constant 0 : i32
    %c0_i32_0 = arith.constant 0 : i32
    return %arg0, %c0_i32 : i32, i32
  }
  func.func @transform_1(%arg0: i32) -> (i32, i32) {
    %c0_i32 = arith.constant 0 : i32
    %c0_i32_0 = arith.constant 0 : i32
    %c0_i32_1 = arith.constant 0 : i32
    return %c0_i32, %c0_i32_0 : i32, i32
  }
  func.func @transform_2(%arg0: i32) -> (i32, i32) {
    %c0_i32 = arith.constant 0 : i32
    %c0_i32_0 = arith.constant 0 : i32
    return %arg0, %c0_i32 : i32, i32
  }
}

module attributes {stable_mosaic.version = 11 : i64} {
  func.func @_aggregate_kernel_bias(%arg0: i32, %arg1: i32, %arg2: memref<128x128xf32, #tpu.memory_space<vmem>>, %arg3: memref<128x128xf32, #tpu.memory_space<vmem>>, %arg4: memref<1x128xf32, #tpu.memory_space<vmem>>, %arg5: memref<128x128xf32, #tpu.memory_space<vmem>>, %arg6: memref<128x128xf32, #tpu.memory_space<vmem>>) attributes {dimension_semantics = [#tpu.dimension_semantics<parallel>, #tpu.dimension_semantics<arbitrary>], iteration_bounds = array<i64: 1, 1>, scalar_prefetch = 0 : i64, scratch_operands = 1 : i64, tpu.core_type = #tpu.core_type<tc>, window_params = [{transform_indices = @transform_0, window_bounds = array<i64: 128, 128>}, {transform_indices = @transform_1, window_bounds = array<i64: 128, 128>}, {pipeline_mode = #tpu.pipeline_mode<synchronous>, transform_indices = @transform_2, window_bounds = array<i64: 1, 128>}, {transform_indices = @transform_3, window_bounds = array<i64: 128, 128>}]} {
    %c0_i32 = arith.constant 0 : i32
    %0 = arith.cmpi eq, %arg1, %c0_i32 : i32
    %1 = arith.extui %0 : i1 to i32
    %c0_i32_0 = arith.constant 0 : i32
    %2 = arith.cmpi ne, %1, %c0_i32_0 : i32
    scf.if %2 {
      %cst_10 = arith.constant 0.000000e+00 : f32
      %12 = vector.broadcast %cst_10 : f32 to vector<128x128xf32>
      %c0_11 = arith.constant 0 : index
      %c0_12 = arith.constant 0 : index
      %13 = vector.load %arg6[%c0_11, %c0_12] : memref<128x128xf32, #tpu.memory_space<vmem>>, vector<128x128xf32>
      tpu.vector_store %arg6[%c0_11, %c0_12], %12 {strides = array<i32>} : memref<128x128xf32, #tpu.memory_space<vmem>>, vector<128x128xf32>,
    } else {
    }
    %c0 = arith.constant 0 : index
    %c0_1 = arith.constant 0 : index
    %3 = vector.load %arg6[%c0, %c0_1] : memref<128x128xf32, #tpu.memory_space<vmem>>, vector<128x128xf32>
    %c0_2 = arith.constant 0 : index
    %c0_3 = arith.constant 0 : index
    %4 = vector.load %arg2[%c0_2, %c0_3] : memref<128x128xf32, #tpu.memory_space<vmem>>, vector<128x128xf32>
    %c0_4 = arith.constant 0 : index
    %c0_5 = arith.constant 0 : index
    %5 = vector.load %arg3[%c0_4, %c0_5] : memref<128x128xf32, #tpu.memory_space<vmem>>, vector<128x128xf32>
    %cst = arith.constant dense<0.000000e+00> : vector<128x128xf32>
    %6 = tpu.matmul %4, %5, %cst {dimension_numbers = #tpu.dot_dimension_numbers<[1], [0], [0], [1], [0, 0, 1, 1], [], []>} : vector<128x128xf32>, vector<128x128xf32>, vector<128x128xf32> -> vector<128x128xf32>
    %7 = arith.addf %3, %6 : vector<128x128xf32>
    %c0_6 = arith.constant 0 : index
    %c0_7 = arith.constant 0 : index
    %8 = vector.load %arg6[%c0_6, %c0_7] : memref<128x128xf32, #tpu.memory_space<vmem>>, vector<128x128xf32>
    tpu.vector_store %arg6[%c0_6, %c0_7], %7 {strides = array<i32>} : memref<128x128xf32, #tpu.memory_space<vmem>>, vector<128x128xf32>,
    %c0_i32_8 = arith.constant 0 : i32
    %9 = arith.cmpi eq, %arg1, %c0_i32_8 : i32
    %10 = arith.extui %9 : i1 to i32
    %c0_i32_9 = arith.constant 0 : i32
    %11 = arith.cmpi ne, %10, %c0_i32_9 : i32
    scf.if %11 {
      %c0_10 = arith.constant 0 : index
      %c0_11 = arith.constant 0 : index
      %12 = vector.load %arg6[%c0_10, %c0_11] : memref<128x128xf32, #tpu.memory_space<vmem>>, vector<128x128xf32>
      %c0_12 = arith.constant 0 : index
      %c0_13 = arith.constant 0 : index
      %13 = vector.load %arg4[%c0_12, %c0_13] : memref<1x128xf32, #tpu.memory_space<vmem>>, vector<1x128xf32>
      %14 = vector.broadcast %13 : vector<1x128xf32> to vector<128x128xf32>
      %15 = arith.addf %12, %14 : vector<128x128xf32>
      %c0_14 = arith.constant 0 : index
      %c0_15 = arith.constant 0 : index
      %16 = vector.load %arg5[%c0_14, %c0_15] : memref<128x128xf32, #tpu.memory_space<vmem>>, vector<128x128xf32>
      tpu.vector_store %arg5[%c0_14, %c0_15], %15 {strides = array<i32>} : memref<128x128xf32, #tpu.memory_space<vmem>>, vector<128x128xf32>,
    } else {
    }
    return
  }
  func.func @transform_0(%arg0: i32, %arg1: i32) -> (i32, i32) {
    %c0_i32 = arith.constant 0 : i32
    return %arg0, %arg1 : i32, i32
  }
  func.func @transform_1(%arg0: i32, %arg1: i32) -> (i32, i32) {
    %c0_i32 = arith.constant 0 : i32
    %c0_i32_0 = arith.constant 0 : i32
    return %arg1, %c0_i32 : i32, i32
  }
  func.func @transform_2(%arg0: i32, %arg1: i32) -> (i32, i32) {
    %c0_i32 = arith.constant 0 : i32
    %c0_i32_0 = arith.constant 0 : i32
    %c0_i32_1 = arith.constant 0 : i32
    return %c0_i32, %c0_i32_0 : i32, i32
  }
  func.func @transform_3(%arg0: i32, %arg1: i32) -> (i32, i32) {
    %c0_i32 = arith.constant 0 : i32
    %c0_i32_0 = arith.constant 0 : i32
    return %arg0, %c0_i32 : i32, i32
  }
}

</mosaic_0001>

<bundles_post_ra>
// kernel: graph_convolution.2
= control target key start
LH: loop header
LB: loop body
LE: loop exit
PB: predicated region body
PF: predicated region fallthrough
CT: control target
= control target key end

     0   :  { %s487_s1 = inlined_call_operand.vmem [shape: f32[128,128], index: 1, kind: input, shape index: {}]   ;;  %s488_s0 = inlined_call_operand.vmem [shape: f32[128,128], index: 0, kind: input, shape index: {}]   ;;  %s489_s2 = inlined_call_operand.vmem [shape: f32[128,128], index: 2, kind: output, shape index: {}]  }
   0x1   :  { %v42_v0 = vld [vmem:[%s487_s1 + $0x78] sm:$0xff]  ;;  %v41_v1 = vld [vmem:[%s487_s1 + $0x70] sm:$0xff]  ;;  %v40_v2 = vld [vmem:[%s487_s1 + $0x68] sm:$0xff] }
   0x2   :  { %240 = vmatprep.subr.mxu0 %v42_v0  ;;  %296 = vmatprep.subr.mxu1 %v42_v0  ;;  %v39_v3 = vld [vmem:[%s487_s1 + $0x60] sm:$0xff]  ;;  %v38_v4 = vld [vmem:[%s487_s1 + $0x58] sm:$0xff]  ;;  %v37_v5 = vld [vmem:[%s487_s1 + $0x50] sm:$0xff] }
   0x3   :  { %241 = vmatpush3.msra.mxu0 %v42_v0  ;;  %312 = vmatpush3.msra.mxu1 %v42_v0  ;;  %v36_v6 = vld [vmem:[%s487_s1 + $0x48] sm:$0xff]  ;;  %v35_v7 = vld [vmem:[%s487_s1 + $0x40] sm:$0xff]  ;;  %v34_v8 = vld [vmem:[%s487_s1 + $0x38] sm:$0xff] }
   0x4   :  { %242 = vmatprep.subr.mxu0 %v41_v1  ;;  %297 = vmatprep.subr.mxu1 %v41_v1  ;;  %v33_v9 = vld [vmem:[%s487_s1 + $0x30] sm:$0xff]  ;;  %v32_v10 = vld [vmem:[%s487_s1 + $0x28] sm:$0xff]  ;;  %v31_v11 = vld [vmem:[%s487_s1 + $0x20] sm:$0xff] }
   0x5   :  { %243 = vmatpush3.msra.mxu0 %v41_v1  ;;  %313 = vmatpush3.msra.mxu1 %v41_v1  ;;  %v30_v12 = vld [vmem:[%s487_s1 + $0x18] sm:$0xff]  ;;  %v29_v13 = vld [vmem:[%s487_s1 + $0x10] sm:$0xff]  ;;  %v28_v14 = vld [vmem:[%s487_s1 + $0x8] sm:$0xff] }
   0x6   :  { %244 = vmatprep.subr.mxu0 %v40_v2  ;;  %298 = vmatprep.subr.mxu1 %v40_v2  ;;  %v27_v15 = vld [vmem:[%s487_s1] sm:$0xff]  ;;  %v12_v18 = vld [vmem:[%s488_s0 + $0x8] sm:$0xff]  ;;  %v13_v20 = vld [vmem:[%s488_s0 + $0x10] sm:$0xff] }
   0x7   :  { %245 = vmatpush3.msra.mxu0 %v40_v2  ;;  %314 = vmatpush3.msra.mxu1 %v40_v2  ;;  %v11_v16 = vld [vmem:[%s488_s0] sm:$0xff]  ;;  %v20_v19 = vld [vmem:[%s488_s0 + $0x48] sm:$0xff]  ;;  %v21_v21 = vld [vmem:[%s488_s0 + $0x50] sm:$0xff] }
   0x8   :  { %246 = vmatprep.subr.mxu0 %v39_v3  ;;  %299 = vmatprep.subr.mxu1 %v39_v3  ;;  %v19_v17 = vld [vmem:[%s488_s0 + $0x40] sm:$0xff]  ;;  %v14_v22 = vld [vmem:[%s488_s0 + $0x18] sm:$0xff]  ;;  %v16_v26 = vld [vmem:[%s488_s0 + $0x28] sm:$0xff] }
   0x9   :  { %247 = vmatpush3.msra.mxu0 %v39_v3  ;;  %315 = vmatpush3.msra.mxu1 %v39_v3  ;;  %v22_v23 = vld [vmem:[%s488_s0 + $0x58] sm:$0xff]  ;;  %v15_v24 = vld [vmem:[%s488_s0 + $0x20] sm:$0xff]  ;;  %v24_v27 = vld [vmem:[%s488_s0 + $0x68] sm:$0xff] }
   0xa   :  { %248 = vmatprep.subr.mxu0 %v38_v4  ;;  %300 = vmatprep.subr.mxu1 %v38_v4  ;;  %v23_v25 = vld [vmem:[%s488_s0 + $0x60] sm:$0xff]  ;;  %v17_v28 = vld [vmem:[%s488_s0 + $0x30] sm:$0xff]  ;;  %v18_v30 = vld [vmem:[%s488_s0 + $0x38] sm:$0xff] }
   0xb   :  { %249 = vmatpush3.msra.mxu0 %v38_v4  ;;  %316 = vmatpush3.msra.mxu1 %v38_v4  ;;  %v25_v29 = vld [vmem:[%s488_s0 + $0x70] sm:$0xff]  ;;  %v26_v31 = vld [vmem:[%s488_s0 + $0x78] sm:$0xff] }
   0xc   :  { %250 = vmatprep.subr.mxu0 %v37_v5  ;;  %301 = vmatprep.subr.mxu1 %v37_v5 }
   0xd   :  { %251 = vmatpush3.msra.mxu0 %v37_v5  ;;  %317 = vmatpush3.msra.mxu1 %v37_v5 }
   0xe   :  { %252 = vmatprep.subr.mxu0 %v36_v6  ;;  %302 = vmatprep.subr.mxu1 %v36_v6 }
   0xf   :  { %253 = vmatpush3.msra.mxu0 %v36_v6  ;;  %318 = vmatpush3.msra.mxu1 %v36_v6 }
  0x10   :  { %254 = vmatprep.subr.mxu0 %v35_v7  ;;  %303 = vmatprep.subr.mxu1 %v35_v7 }
  0x11   :  { %255 = vmatpush3.msra.mxu0 %v35_v7  ;;  %319 = vmatpush3.msra.mxu1 %v35_v7 }
  0x12   :  { %256 = vmatprep.subr.mxu0 %v34_v8  ;;  %304 = vmatprep.subr.mxu1 %v34_v8 }
  0x13   :  { %257 = vmatpush3.msra.mxu0 %v34_v8  ;;  %320 = vmatpush3.msra.mxu1 %v34_v8 }
  0x14   :  { %258 = vmatprep.subr.mxu0 %v33_v9  ;;  %305 = vmatprep.subr.mxu1 %v33_v9 }
  0x15   :  { %259 = vmatpush3.msra.mxu0 %v33_v9  ;;  %321 = vmatpush3.msra.mxu1 %v33_v9 }
  0x16   :  { %260 = vmatprep.subr.mxu0 %v32_v10  ;;  %306 = vmatprep.subr.mxu1 %v32_v10 }
  0x17   :  { %261 = vmatpush3.msra.mxu0 %v32_v10  ;;  %322 = vmatpush3.msra.mxu1 %v32_v10 }
  0x18   :  { %262 = vmatprep.subr.mxu0 %v31_v11  ;;  %307 = vmatprep.subr.mxu1 %v31_v11 }
  0x19   :  { %263 = vmatpush3.msra.mxu0 %v31_v11  ;;  %323 = vmatpush3.msra.mxu1 %v31_v11 }
  0x1a   :  { %264 = vmatprep.subr.mxu0 %v30_v12  ;;  %308 = vmatprep.subr.mxu1 %v30_v12 }
  0x1b   :  { %265 = vmatpush3.msra.mxu0 %v30_v12  ;;  %324 = vmatpush3.msra.mxu1 %v30_v12 }
  0x1c   :  { %266 = vmatprep.subr.mxu0 %v29_v13  ;;  %309 = vmatprep.subr.mxu1 %v29_v13 }
  0x1d   :  { %267 = vmatpush3.msra.mxu0 %v29_v13  ;;  %325 = vmatpush3.msra.mxu1 %v29_v13 }
  0x1e   :  { %268 = vmatprep.subr.mxu0 %v28_v14  ;;  %310 = vmatprep.subr.mxu1 %v28_v14 }
  0x1f   :  { %269 = vmatpush3.msra.mxu0 %v28_v14  ;;  %326 = vmatpush3.msra.mxu1 %v28_v14 }
  0x20   :  { %270 = vmatprep.subr.mxu0 %v27_v15  ;;  %311 = vmatprep.subr.mxu1 %v27_v15 }
  0x21   :  { %271 = vmatpush3.msra.mxu0 %v27_v15  ;;  %327 = vmatpush3.msra.mxu1 %v27_v15 }
  0x22   :  { %272 = vmatprep.mubr.f32.mxu0 %v11_v16  ;;  %284 = vmatprep.mubr.f32.mxu1 %v19_v17 }
  0x23   :  { %273 = vmatmul.mubr.f32.vlgmr.msra.gmra.mxu0 %v12_v18  ;;  %285 = vmatmul.mubr.f32.vlgmr.msra.gmra.mxu1 %v20_v19 }
  0x24   :  { %275 = vmatprep.mubr.f32.mxu0 %v13_v20  ;;  %287 = vmatprep.mubr.f32.mxu1 %v21_v21 }
  0x27   :  { %276 = vmatmul.mubr.f32.gmra.mxu0 %v14_v22  ;;  %288 = vmatmul.mubr.f32.gmra.mxu1 %v22_v23 }
  0x28   :  { %278 = vmatprep.mubr.f32.mxu0 %v15_v24  ;;  %290 = vmatprep.mubr.f32.mxu1 %v23_v25 }
  0x2b   :  { %279 = vmatmul.mubr.f32.gmra.mxu0 %v16_v26  ;;  %291 = vmatmul.mubr.f32.gmra.mxu1 %v24_v27 }
  0x2c   :  { %281 = vmatprep.mubr.f32.mxu0 %v17_v28  ;;  %293 = vmatprep.mubr.f32.mxu1 %v25_v29 }
  0x2f   :  { %282 = vmatmul.mubr.f32.gmra.mxu0 %v18_v30  ;;  %294 = vmatmul.mubr.f32.gmra.mxu1 %v26_v31 }
  0xe3   :  { %v274_v32 = vpop.f32.mrf.mxu0  ;;  %v286_v33 = vpop.f32.mrf.mxu1 }
  0xe4   :  { %189 = vst [vmem:[%s489_s2 + $0x8] sm:$0xff] %v274_v32  ;;  %197 = vst [vmem:[%s489_s2 + $0x48] sm:$0xff] %v286_v33 }
  0xe5   :  { %v109_v34 = vpop.f32.mrf.mxu0  ;;  %v149_v35 = vpop.f32.mrf.mxu1 }
  0xe6   :  { %188 = vst [vmem:[%s489_s2] sm:$0xff] %v109_v34  ;;  %196 = vst [vmem:[%s489_s2 + $0x40] sm:$0xff] %v149_v35 }
  0xe7   :  { %v277_v36 = vpop.f32.mrf.mxu0  ;;  %v289_v37 = vpop.f32.mrf.mxu1 }
  0xe8   :  { %191 = vst [vmem:[%s489_s2 + $0x18] sm:$0xff] %v277_v36  ;;  %199 = vst [vmem:[%s489_s2 + $0x58] sm:$0xff] %v289_v37 }
  0xe9   :  { %v119_v38 = vpop.f32.mrf.mxu0  ;;  %v159_v39 = vpop.f32.mrf.mxu1 }
  0xea   :  { %190 = vst [vmem:[%s489_s2 + $0x10] sm:$0xff] %v119_v38  ;;  %198 = vst [vmem:[%s489_s2 + $0x50] sm:$0xff] %v159_v39 }
  0xeb   :  { %v280_v40 = vpop.f32.mrf.mxu0  ;;  %v292_v41 = vpop.f32.mrf.mxu1 }
  0xec   :  { %193 = vst [vmem:[%s489_s2 + $0x28] sm:$0xff] %v280_v40  ;;  %201 = vst [vmem:[%s489_s2 + $0x68] sm:$0xff] %v292_v41 }
  0xed   :  { %v129_v42 = vpop.f32.mrf.mxu0  ;;  %v169_v43 = vpop.f32.mrf.mxu1 }
  0xee   :  { %192 = vst [vmem:[%s489_s2 + $0x20] sm:$0xff] %v129_v42  ;;  %200 = vst [vmem:[%s489_s2 + $0x60] sm:$0xff] %v169_v43 }
  0xef   :  { %v283_v44 = vpop.f32.mrf.mxu0  ;;  %v295_v45 = vpop.f32.mrf.mxu1 }
  0xf0   :  { %195 = vst [vmem:[%s489_s2 + $0x38] sm:$0xff] %v283_v44  ;;  %203 = vst [vmem:[%s489_s2 + $0x78] sm:$0xff] %v295_v45 }
  0xf1   :  { %v139_v46 = vpop.f32.mrf.mxu0  ;;  %v179_v47 = vpop.f32.mrf.mxu1 }
  0xf2   :  { %194 = vst [vmem:[%s489_s2 + $0x30] sm:$0xff] %v139_v46  ;;  %202 = vst [vmem:[%s489_s2 + $0x70] sm:$0xff] %v179_v47 }

// kernel: graph_convolution.3
= control target key start
LH: loop header
LB: loop body
LE: loop exit
PB: predicated region body
PF: predicated region fallthrough
CT: control target
= control target key end

     0   :  { %s609_s1 = inlined_call_operand.vmem [shape: f32[128,128], index: 1, kind: input, shape index: {}]   ;;  %s610_s0 = inlined_call_operand.vmem [shape: f32[128,128], index: 0, kind: input, shape index: {}]   ;;  %s611_s2 = inlined_call_operand.vmem [shape: f32[1,128], index: 2, kind: input, shape index: {}]   ;;  %s612_s3 = inlined_call_operand.vmem [shape: f32[128,128], index: 3, kind: output, shape index: {}]  }
   0x1   :  { %v81_v0 = vld [vmem:[%s609_s1 + $0x78] sm:$0xff]  ;;  %v80_v1 = vld [vmem:[%s609_s1 + $0x70] sm:$0xff]  ;;  %v79_v2 = vld [vmem:[%s609_s1 + $0x68] sm:$0xff] }
   0x2   :  { %354 = vmatprep.subr.mxu0 %v81_v0  ;;  %410 = vmatprep.subr.mxu1 %v81_v0  ;;  %v78_v3 = vld [vmem:[%s609_s1 + $0x60] sm:$0xff]  ;;  %v77_v4 = vld [vmem:[%s609_s1 + $0x58] sm:$0xff]  ;;  %v76_v5 = vld [vmem:[%s609_s1 + $0x50] sm:$0xff] }
   0x3   :  { %355 = vmatpush3.msra.mxu0 %v81_v0  ;;  %426 = vmatpush3.msra.mxu1 %v81_v0  ;;  %v75_v6 = vld [vmem:[%s609_s1 + $0x48] sm:$0xff]  ;;  %v74_v7 = vld [vmem:[%s609_s1 + $0x40] sm:$0xff]  ;;  %v73_v8 = vld [vmem:[%s609_s1 + $0x38] sm:$0xff] }
   0x4   :  { %356 = vmatprep.subr.mxu0 %v80_v1  ;;  %411 = vmatprep.subr.mxu1 %v80_v1  ;;  %v72_v9 = vld [vmem:[%s609_s1 + $0x30] sm:$0xff]  ;;  %v71_v10 = vld [vmem:[%s609_s1 + $0x28] sm:$0xff]  ;;  %v70_v11 = vld [vmem:[%s609_s1 + $0x20] sm:$0xff] }
   0x5   :  { %357 = vmatpush3.msra.mxu0 %v80_v1  ;;  %427 = vmatpush3.msra.mxu1 %v80_v1  ;;  %v69_v12 = vld [vmem:[%s609_s1 + $0x18] sm:$0xff]  ;;  %v68_v13 = vld [vmem:[%s609_s1 + $0x10] sm:$0xff]  ;;  %v67_v14 = vld [vmem:[%s609_s1 + $0x8] sm:$0xff] }
   0x6   :  { %358 = vmatprep.subr.mxu0 %v79_v2  ;;  %412 = vmatprep.subr.mxu1 %v79_v2  ;;  %v66_v15 = vld [vmem:[%s609_s1] sm:$0xff]  ;;  %v51_v18 = vld [vmem:[%s610_s0 + $0x8] sm:$0xff]  ;;  %v52_v20 = vld [vmem:[%s610_s0 + $0x10] sm:$0xff] }
   0x7   :  { %359 = vmatpush3.msra.mxu0 %v79_v2  ;;  %428 = vmatpush3.msra.mxu1 %v79_v2  ;;  %v50_v16 = vld [vmem:[%s610_s0] sm:$0xff]  ;;  %v59_v19 = vld [vmem:[%s610_s0 + $0x48] sm:$0xff]  ;;  %v60_v21 = vld [vmem:[%s610_s0 + $0x50] sm:$0xff] }
   0x8   :  { %360 = vmatprep.subr.mxu0 %v78_v3  ;;  %413 = vmatprep.subr.mxu1 %v78_v3  ;;  %v58_v17 = vld [vmem:[%s610_s0 + $0x40] sm:$0xff]  ;;  %v53_v22 = vld [vmem:[%s610_s0 + $0x18] sm:$0xff]  ;;  %v55_v26 = vld [vmem:[%s610_s0 + $0x28] sm:$0xff] }
   0x9   :  { %361 = vmatpush3.msra.mxu0 %v78_v3  ;;  %429 = vmatpush3.msra.mxu1 %v78_v3  ;;  %v61_v23 = vld [vmem:[%s610_s0 + $0x58] sm:$0xff]  ;;  %v54_v24 = vld [vmem:[%s610_s0 + $0x20] sm:$0xff]  ;;  %v63_v27 = vld [vmem:[%s610_s0 + $0x68] sm:$0xff] }
   0xa   :  { %362 = vmatprep.subr.mxu0 %v77_v4  ;;  %414 = vmatprep.subr.mxu1 %v77_v4  ;;  %v62_v25 = vld [vmem:[%s610_s0 + $0x60] sm:$0xff]  ;;  %v56_v28 = vld [vmem:[%s610_s0 + $0x30] sm:$0xff]  ;;  %v57_v30 = vld [vmem:[%s610_s0 + $0x38] sm:$0xff] }
   0xb   :  { %363 = vmatpush3.msra.mxu0 %v77_v4  ;;  %430 = vmatpush3.msra.mxu1 %v77_v4  ;;  %v64_v29 = vld [vmem:[%s610_s0 + $0x70] sm:$0xff]  ;;  %v65_v31 = vld [vmem:[%s610_s0 + $0x78] sm:$0xff]  ;;  %v321_v32 = vld [vmem:[%s611_s2] ss:$0 sm:$0xff] }
   0xc   :  { %364 = vmatprep.subr.mxu0 %v76_v5  ;;  %415 = vmatprep.subr.mxu1 %v76_v5 }
   0xd   :  { %365 = vmatpush3.msra.mxu0 %v76_v5  ;;  %431 = vmatpush3.msra.mxu1 %v76_v5 }
   0xe   :  { %366 = vmatprep.subr.mxu0 %v75_v6  ;;  %416 = vmatprep.subr.mxu1 %v75_v6 }
   0xf   :  { %367 = vmatpush3.msra.mxu0 %v75_v6  ;;  %432 = vmatpush3.msra.mxu1 %v75_v6 }
  0x10   :  { %368 = vmatprep.subr.mxu0 %v74_v7  ;;  %417 = vmatprep.subr.mxu1 %v74_v7 }
  0x11   :  { %369 = vmatpush3.msra.mxu0 %v74_v7  ;;  %433 = vmatpush3.msra.mxu1 %v74_v7 }
  0x12   :  { %370 = vmatprep.subr.mxu0 %v73_v8  ;;  %418 = vmatprep.subr.mxu1 %v73_v8 }
  0x13   :  { %371 = vmatpush3.msra.mxu0 %v73_v8  ;;  %434 = vmatpush3.msra.mxu1 %v73_v8 }
  0x14   :  { %372 = vmatprep.subr.mxu0 %v72_v9  ;;  %419 = vmatprep.subr.mxu1 %v72_v9 }
  0x15   :  { %373 = vmatpush3.msra.mxu0 %v72_v9  ;;  %435 = vmatpush3.msra.mxu1 %v72_v9 }
  0x16   :  { %374 = vmatprep.subr.mxu0 %v71_v10  ;;  %420 = vmatprep.subr.mxu1 %v71_v10 }
  0x17   :  { %375 = vmatpush3.msra.mxu0 %v71_v10  ;;  %436 = vmatpush3.msra.mxu1 %v71_v10 }
  0x18   :  { %376 = vmatprep.subr.mxu0 %v70_v11  ;;  %421 = vmatprep.subr.mxu1 %v70_v11 }
  0x19   :  { %377 = vmatpush3.msra.mxu0 %v70_v11  ;;  %437 = vmatpush3.msra.mxu1 %v70_v11 }
  0x1a   :  { %378 = vmatprep.subr.mxu0 %v69_v12  ;;  %422 = vmatprep.subr.mxu1 %v69_v12 }
  0x1b   :  { %379 = vmatpush3.msra.mxu0 %v69_v12  ;;  %438 = vmatpush3.msra.mxu1 %v69_v12 }
  0x1c   :  { %380 = vmatprep.subr.mxu0 %v68_v13  ;;  %423 = vmatprep.subr.mxu1 %v68_v13 }
  0x1d   :  { %381 = vmatpush3.msra.mxu0 %v68_v13  ;;  %439 = vmatpush3.msra.mxu1 %v68_v13 }
  0x1e   :  { %382 = vmatprep.subr.mxu0 %v67_v14  ;;  %424 = vmatprep.subr.mxu1 %v67_v14 }
  0x1f   :  { %383 = vmatpush3.msra.mxu0 %v67_v14  ;;  %440 = vmatpush3.msra.mxu1 %v67_v14 }
  0x20   :  { %384 = vmatprep.subr.mxu0 %v66_v15  ;;  %425 = vmatprep.subr.mxu1 %v66_v15 }
  0x21   :  { %385 = vmatpush3.msra.mxu0 %v66_v15  ;;  %441 = vmatpush3.msra.mxu1 %v66_v15 }
  0x22   :  { %386 = vmatprep.mubr.f32.mxu0 %v50_v16  ;;  %398 = vmatprep.mubr.f32.mxu1 %v58_v17 }
  0x23   :  { %387 = vmatmul.mubr.f32.vlgmr.msra.gmra.mxu0 %v51_v18  ;;  %399 = vmatmul.mubr.f32.vlgmr.msra.gmra.mxu1 %v59_v19 }
  0x24   :  { %389 = vmatprep.mubr.f32.mxu0 %v52_v20  ;;  %401 = vmatprep.mubr.f32.mxu1 %v60_v21 }
  0x27   :  { %390 = vmatmul.mubr.f32.gmra.mxu0 %v53_v22  ;;  %402 = vmatmul.mubr.f32.gmra.mxu1 %v61_v23 }
  0x28   :  { %392 = vmatprep.mubr.f32.mxu0 %v54_v24  ;;  %404 = vmatprep.mubr.f32.mxu1 %v62_v25 }
  0x2b   :  { %393 = vmatmul.mubr.f32.gmra.mxu0 %v55_v26  ;;  %405 = vmatmul.mubr.f32.gmra.mxu1 %v63_v27 }
  0x2c   :  { %395 = vmatprep.mubr.f32.mxu0 %v56_v28  ;;  %407 = vmatprep.mubr.f32.mxu1 %v64_v29 }
  0x2f   :  { %396 = vmatmul.mubr.f32.gmra.mxu0 %v57_v30  ;;  %408 = vmatmul.mubr.f32.gmra.mxu1 %v65_v31 }
  0xe3   :  { %v388_v33 = vpop.f32.mrf.mxu0  ;;  %v400_v34 = vpop.f32.mrf.mxu1 }
  0xe4   :  { %v286_v35 = vadd.f32 %v388_v33, %v321_v32  ;;  %v294_v36 = vadd.f32 %v400_v34, %v321_v32 }
  0xe5   :  { %v148_v37 = vpop.f32.mrf.mxu0  ;;  %v188_v38 = vpop.f32.mrf.mxu1 }
  0xe6   :  { %302 = vst [vmem:[%s612_s3 + $0x8] sm:$0xff] %v286_v35  ;;  %310 = vst [vmem:[%s612_s3 + $0x48] sm:$0xff] %v294_v36  ;;  %v285_v39 = vadd.f32 %v321_v32, %v148_v37  ;;  %v293_v40 = vadd.f32 %v321_v32, %v188_v38 }
  0xe7   :  { %v391_v41 = vpop.f32.mrf.mxu0  ;;  %v403_v42 = vpop.f32.mrf.mxu1 }
  0xe8   :  { %301 = vst [vmem:[%s612_s3] sm:$0xff] %v285_v39  ;;  %309 = vst [vmem:[%s612_s3 + $0x40] sm:$0xff] %v293_v40  ;;  %v288_v43 = vadd.f32 %v391_v41, %v321_v32  ;;  %v296_v44 = vadd.f32 %v403_v42, %v321_v32 }
  0xe9   :  { %v158_v45 = vpop.f32.mrf.mxu0  ;;  %v198_v46 = vpop.f32.mrf.mxu1 }
  0xea   :  { %304 = vst [vmem:[%s612_s3 + $0x18] sm:$0xff] %v288_v43  ;;  %312 = vst [vmem:[%s612_s3 + $0x58] sm:$0xff] %v296_v44  ;;  %v287_v47 = vadd.f32 %v321_v32, %v158_v45  ;;  %v295_v48 = vadd.f32 %v321_v32, %v198_v46 }
  0xeb   :  { %v394_v49 = vpop.f32.mrf.mxu0  ;;  %v406_v50 = vpop.f32.mrf.mxu1 }
  0xec   :  { %303 = vst [vmem:[%s612_s3 + $0x10] sm:$0xff] %v287_v47  ;;  %311 = vst [vmem:[%s612_s3 + $0x50] sm:$0xff] %v295_v48  ;;  %v290_v51 = vadd.f32 %v394_v49, %v321_v32  ;;  %v298_v52 = vadd.f32 %v406_v50, %v321_v32 }
  0xed   :  { %v168_v53 = vpop.f32.mrf.mxu0  ;;  %v208_v54 = vpop.f32.mrf.mxu1 }
  0xee   :  { %306 = vst [vmem:[%s612_s3 + $0x28] sm:$0xff] %v290_v51  ;;  %314 = vst [vmem:[%s612_s3 + $0x68] sm:$0xff] %v298_v52  ;;  %v289_v55 = vadd.f32 %v321_v32, %v168_v53  ;;  %v297_v56 = vadd.f32 %v321_v32, %v208_v54 }
  0xef   :  { %v397_v57 = vpop.f32.mrf.mxu0  ;;  %v409_v58 = vpop.f32.mrf.mxu1 }
  0xf0   :  { %305 = vst [vmem:[%s612_s3 + $0x20] sm:$0xff] %v289_v55  ;;  %313 = vst [vmem:[%s612_s3 + $0x60] sm:$0xff] %v297_v56  ;;  %v292_v59 = vadd.f32 %v397_v57, %v321_v32  ;;  %v300_v60 = vadd.f32 %v409_v58, %v321_v32 }
  0xf1   :  { %v178_v61 = vpop.f32.mrf.mxu0  ;;  %v218_v62 = vpop.f32.mrf.mxu1 }
  0xf2   :  { %308 = vst [vmem:[%s612_s3 + $0x38] sm:$0xff] %v292_v59  ;;  %316 = vst [vmem:[%s612_s3 + $0x78] sm:$0xff] %v300_v60  ;;  %v291_v63 = vadd.f32 %v321_v32, %v178_v61  ;;  %v299_v0 = vadd.f32 %v321_v32, %v218_v62 }
  0xf4   :  { %307 = vst [vmem:[%s612_s3 + $0x30] sm:$0xff] %v291_v63  ;;  %315 = vst [vmem:[%s612_s3 + $0x70] sm:$0xff] %v299_v0 }

</bundles_post_ra>
